<compile_context>
chip_gen: v6e
topology: v6e:2x2x1
jax: 0.10.0
libtpu: 0.0.40
codegen_flags: <defaults>
</compile_context>

<pallas_src>
import math

import jax
import jax.numpy as jnp
import numpy as np
from jax import lax
from jax.experimental import pallas as pl
from jax.experimental.pallas import tpu as pltpu


def make_mha_kernel(num_heads, head_dim, seq_q, seq_kv, block_b, num_hiddens):
    scale = 1.0 / math.sqrt(head_dim)

    def kernel(valid_ref, q_ref, k_ref, v_ref,
               wq_ref, wk_ref, wv_ref, wo_ref, out_ref):
        blk = pl.program_id(0)

        # Batch block folded into the matmul M dimension; bf16 MXU inputs.
        q_flat = q_ref[...].astype(jnp.bfloat16)   # (block_b*seq_q,  d_q)
        k_flat = k_ref[...].astype(jnp.bfloat16)   # (block_b*seq_kv, d_k)
        v_flat = v_ref[...].astype(jnp.bfloat16)   # (block_b*seq_kv, d_v)

        # Per-head projections for the whole batch block (weights are pre-split
        # per head in the wrapper -> no in-kernel lane slicing).
        qh = [jnp.dot(q_flat, wq_ref[h], preferred_element_type=jnp.float32)
              for h in range(num_heads)]            # each (block_b*seq_q,  hd) f32
        kh = [jnp.dot(k_flat, wk_ref[h], preferred_element_type=jnp.float32)
              for h in range(num_heads)]            # each (block_b*seq_kv, hd) f32
        vh = [jnp.dot(v_flat, wv_ref[h], preferred_element_type=jnp.float32)
              for h in range(num_heads)]

        kv_iota = lax.broadcasted_iota(jnp.int32, (seq_q, seq_kv), 1)

        for i in range(block_b):                    # static, unrolled
            # Additive mask bias computed once per batch row, shared by all heads.
            vlen = valid_ref[blk * block_b + i]
            bias = jnp.where(kv_iota < vlen, 0.0, -1000000.0).astype(jnp.float32)

            q_lo = i * seq_q
            k_lo = i * seq_kv
            acc = jnp.zeros((seq_q, num_hiddens), jnp.float32)

            for h in range(num_heads):              # static, unrolled
                q_i = qh[h][q_lo:q_lo + seq_q].astype(jnp.bfloat16)    # (Sq,  hd)
                k_i = kh[h][k_lo:k_lo + seq_kv].astype(jnp.bfloat16)   # (Skv, hd)
                v_i = vh[h][k_lo:k_lo + seq_kv].astype(jnp.bfloat16)   # (Skv, hd)

                s = jnp.einsum("qe,ke->qk", q_i, k_i,
                               preferred_element_type=jnp.float32)
                s = s * scale + bias                                    # f32

                # numerically stable softmax (f32), reciprocal on the EUP
                m = jnp.max(s, axis=-1, keepdims=True)
                e = jnp.exp(s - m)
                p = e * pl.reciprocal(jnp.sum(e, axis=-1, keepdims=True),
                                      approx=True)

                ho = jnp.dot(p.astype(jnp.bfloat16), v_i,
                             preferred_element_type=jnp.float32)        # (Sq, hd)

                # Output projection accumulated per head -> no concat needed:
                # concat @ Wo == sum_h head_out_h @ Wo[h*hd:(h+1)*hd, :]
                acc = acc + jnp.dot(ho.astype(jnp.bfloat16), wo_ref[h],
                                    preferred_element_type=jnp.float32)

            out_ref[q_lo:q_lo + seq_q, :] = acc

    return kernel


def _pick_block_b(batch, seq_q):
    """Fold batch into M (target >=128 rows/step) but keep >=2 grid steps
    when the batch allows, so both v7x TensorCores get work."""
    if batch <= 1:
        return 1
    target = max(1, 128 // max(seq_q, 1))
    bb = max(1, min(batch // 2, target))
    while batch % bb:
        bb -= 1
    return bb


def multi_head_attention(queries, keys, values, valid_lens,
                         w_q, w_k, w_v, w_o, num_heads, block_b=None):
    """queries: (B, Sq, Dq), keys: (B, Skv, Dk), values: (B, Skv, Dv),
    valid_lens: (B,) int32 or None. Weights are (in_dim, num_hiddens)."""
    B, seq_q, d_q = queries.shape
    _, seq_kv, d_k = keys.shape
    _, _, d_v = values.shape
    num_hiddens = w_q.shape[1]
    head_dim = num_hiddens // num_heads

    if valid_lens is None:
        valid_lens = jnp.full((B,), seq_kv, dtype=jnp.int32)
    # TODO(synk): only 1-D (batch,) valid_lens supported; 2-D per-query lengths
    # would need a (B, Sq, Skv)-style bias input.
    valid_lens = valid_lens.astype(jnp.int32)

    if block_b is None:
        block_b = _pick_block_b(B, seq_q)
    # (8,128) sublane rule: fall back to a full-batch block if needed.
    if (block_b * seq_q) % 8 or (block_b * seq_kv) % 8:
        block_b = B

    # Flatten batch into the matmul M dimension (free row-major reshapes).
    q2 = queries.reshape(B * seq_q, d_q)
    k2 = keys.reshape(B * seq_kv, d_k)
    v2 = values.reshape(B * seq_kv, d_v)

    # Per-head weight layout (head along a leading dim) + bf16 for the MXU.
    wq_h = w_q.reshape(d_q, num_heads, head_dim).transpose(1, 0, 2).astype(jnp.bfloat16)
    wk_h = w_k.reshape(d_k, num_heads, head_dim).transpose(1, 0, 2).astype(jnp.bfloat16)
    wv_h = w_v.reshape(d_v, num_heads, head_dim).transpose(1, 0, 2).astype(jnp.bfloat16)
    wo_h = w_o.reshape(num_heads, head_dim, num_hiddens).astype(jnp.bfloat16)

    kernel = make_mha_kernel(num_heads, head_dim, seq_q, seq_kv,
                             block_b, num_hiddens)

    grid_spec = pltpu.PrefetchScalarGridSpec(
        num_scalar_prefetch=1,
        grid=(B // block_b,),
        in_specs=[
            pl.BlockSpec((block_b * seq_q, d_q), lambda b, vl: (b, 0)),
            pl.BlockSpec((block_b * seq_kv, d_k), lambda b, vl: (b, 0)),
            pl.BlockSpec((block_b * seq_kv, d_v), lambda b, vl: (b, 0)),
            # Weights: constant index_map -> fetched once, not re-pipelined.
            pl.BlockSpec((num_heads, d_q, head_dim), lambda b, vl: (0, 0, 0)),
            pl.BlockSpec((num_heads, d_k, head_dim), lambda b, vl: (0, 0, 0)),
            pl.BlockSpec((num_heads, d_v, head_dim), lambda b, vl: (0, 0, 0)),
            pl.BlockSpec((num_heads, head_dim, num_hiddens), lambda b, vl: (0, 0, 0)),
        ],
        out_specs=pl.BlockSpec((block_b * seq_q, num_hiddens), lambda b, vl: (b, 0)),
    )

    out2 = pl.pallas_call(
        kernel,
        out_shape=jax.ShapeDtypeStruct((B * seq_q, num_hiddens), jnp.float32),
        grid_spec=grid_spec,
        compiler_params=pltpu.CompilerParams(
            dimension_semantics=("parallel",)),
    )(valid_lens, q2, k2, v2, wq_h, wk_h, wv_h, wo_h)

    return out2.reshape(B, seq_q, num_hiddens)


def reference_mha(queries, keys, values, valid_lens,
                  w_q, w_k, w_v, w_o, num_heads):
    """Pure-JAX (f32) reference mirroring the PyTorch module exactly."""
    B, Sq, _ = queries.shape
    _, Skv, _ = keys.shape
    H = w_q.shape[1]
    d = H // num_heads

    def split(x):  # transpose_qkv
        x = x.reshape(B, -1, num_heads, d).transpose(0, 2, 1, 3)
        return x.reshape(B * num_heads, -1, d)

    q = split(queries @ w_q)
    k = split(keys @ w_k)
    v = split(values @ w_v)

    scores = jnp.einsum("bqd,bkd->bqk", q, k) / math.sqrt(d)
    if valid_lens is not None:
        vl = jnp.repeat(valid_lens, num_heads)                     # (B*heads,)
        mask = jnp.arange(Skv)[None, None, :] < vl[:, None, None]  # (B*h,1,Skv)
        scores = jnp.where(mask, scores, -1000000.0)
    attn = jax.nn.softmax(scores, axis=-1)
    out = jnp.einsum("bqk,bkd->bqd", attn, v)                      # (B*h, Sq, d)
    out = out.reshape(B, num_heads, Sq, d).transpose(0, 2, 1, 3).reshape(B, Sq, H)
    return out @ w_o


if __name__ == "__main__":
    # Small deterministic problem.
    batch = 2
    seq_q = 8
    seq_kv = 8
    key_size = query_size = value_size = 32
    num_hiddens = 32
    num_heads = 4

    key = jax.random.PRNGKey(0)
    kq, kk, kv, kwq, kwk, kwv, kwo = jax.random.split(key, 7)

    queries = jax.random.normal(kq, (batch, seq_q, query_size), jnp.float32)
    keys = jax.random.normal(kk, (batch, seq_kv, key_size), jnp.float32)
    values = jax.random.normal(kv, (batch, seq_kv, value_size), jnp.float32)
    valid_lens = jnp.array([3, 6], dtype=jnp.int32)

    # Deterministic weight init (nn.Linear-like uniform bound), stored as (in, out).
    def init_w(k, fan_in, fan_out):
        bound = 1.0 / math.sqrt(fan_in)
        return jax.random.uniform(k, (fan_in, fan_out), jnp.float32, -bound, bound)

    w_q = init_w(kwq, query_size, num_hiddens)
    w_k = init_w(kwk, key_size, num_hiddens)
    w_v = init_w(kwv, value_size, num_hiddens)
    w_o = init_w(kwo, num_hiddens, num_hiddens)

    out = multi_head_attention(queries, keys, values, valid_lens,
                               w_q, w_k, w_v, w_o, num_heads)
    out = jax.block_until_ready(out)

    ref = reference_mha(queries, keys, values, valid_lens,
                        w_q, w_k, w_v, w_o, num_heads)
    # bf16 MXU inputs (f32 accumulation) => loosen tolerance vs the f32 reference.
    np.testing.assert_allclose(np.asarray(out), np.asarray(ref),
                               rtol=3e-2, atol=3e-2)
    print("KERNEL_OK")
</pallas_src>

<mosaic_0001>
module attributes {stable_mosaic.version = 11 : i64} {
  func.func @kernel(%arg0: i32, %arg1: memref<2xi32, #tpu.memory_space<smem>>, %arg2: memref<8x32xf32, #tpu.memory_space<vmem>>, %arg3: memref<8x32xf32, #tpu.memory_space<vmem>>, %arg4: memref<8x32xf32, #tpu.memory_space<vmem>>, %arg5: memref<4x32x8xbf16, #tpu.memory_space<vmem>>, %arg6: memref<4x32x8xbf16, #tpu.memory_space<vmem>>, %arg7: memref<4x32x8xbf16, #tpu.memory_space<vmem>>, %arg8: memref<4x8x32xbf16, #tpu.memory_space<vmem>>, %arg9: memref<8x32xf32, #tpu.memory_space<vmem>>) attributes {dimension_semantics = [#tpu.dimension_semantics<parallel>], iteration_bounds = array<i64: 2>, scalar_prefetch = 1 : i64, scratch_operands = 0 : i64, tpu.core_type = #tpu.core_type<tc>, window_params = [{transform_indices = @transform_0, window_bounds = array<i64: 8, 32>}, {transform_indices = @transform_1, window_bounds = array<i64: 8, 32>}, {transform_indices = @transform_2, window_bounds = array<i64: 8, 32>}, {pipeline_mode = #tpu.pipeline_mode<synchronous>, transform_indices = @transform_3, window_bounds = array<i64: 4, 32, 8>}, {pipeline_mode = #tpu.pipeline_mode<synchronous>, transform_indices = @transform_4, window_bounds = array<i64: 4, 32, 8>}, {pipeline_mode = #tpu.pipeline_mode<synchronous>, transform_indices = @transform_5, window_bounds = array<i64: 4, 32, 8>}, {pipeline_mode = #tpu.pipeline_mode<synchronous>, transform_indices = @transform_6, window_bounds = array<i64: 4, 8, 32>}, {transform_indices = @transform_7, window_bounds = array<i64: 8, 32>}]} {
    %c0 = arith.constant 0 : index
    %c0_0 = arith.constant 0 : index
    %0 = vector.load %arg2[%c0, %c0_0] : memref<8x32xf32, #tpu.memory_space<vmem>>, vector<8x32xf32>
    %1 = arith.truncf %0 : vector<8x32xf32> to vector<8x32xbf16>
    %c0_1 = arith.constant 0 : index
    %c0_2 = arith.constant 0 : index
    %2 = vector.load %arg3[%c0_1, %c0_2] : memref<8x32xf32, #tpu.memory_space<vmem>>, vector<8x32xf32>
    %3 = arith.truncf %2 : vector<8x32xf32> to vector<8x32xbf16>
    %c0_3 = arith.constant 0 : index
    %c0_4 = arith.constant 0 : index
    %4 = vector.load %arg4[%c0_3, %c0_4] : memref<8x32xf32, #tpu.memory_space<vmem>>, vector<8x32xf32>
    %5 = arith.truncf %4 : vector<8x32xf32> to vector<8x32xbf16>
    %c0_5 = arith.constant 0 : index
    %c0_6 = arith.constant 0 : index
    %c0_7 = arith.constant 0 : index
    %6 = vector.load %arg5[%c0_5, %c0_6, %c0_7] : memref<4x32x8xbf16, #tpu.memory_space<vmem>>, vector<1x32x8xbf16>
    %7 = vector.shape_cast %6 : vector<1x32x8xbf16> to vector<32x8xbf16>
    %cst = arith.constant dense<0.000000e+00> : vector<8x8xf32>
    %8 = tpu.matmul %1, %7, %cst {dimension_numbers = #tpu.dot_dimension_numbers<[1], [0], [0], [1], [0, 0, 1, 1], [], []>} : vector<8x32xbf16>, vector<32x8xbf16>, vector<8x8xf32> -> vector<8x8xf32>
    %c1 = arith.constant 1 : index
    %c0_8 = arith.constant 0 : index
    %c0_9 = arith.constant 0 : index
    %9 = vector.load %arg5[%c1, %c0_8, %c0_9] : memref<4x32x8xbf16, #tpu.memory_space<vmem>>, vector<1x32x8xbf16>
    %10 = vector.shape_cast %9 : vector<1x32x8xbf16> to vector<32x8xbf16>
    %cst_10 = arith.constant dense<0.000000e+00> : vector<8x8xf32>
    %11 = tpu.matmul %1, %10, %cst_10 {dimension_numbers = #tpu.dot_dimension_numbers<[1], [0], [0], [1], [0, 0, 1, 1], [], []>} : vector<8x32xbf16>, vector<32x8xbf16>, vector<8x8xf32> -> vector<8x8xf32>
    %c2 = arith.constant 2 : index
    %c0_11 = arith.constant 0 : index
    %c0_12 = arith.constant 0 : index
    %12 = vector.load %arg5[%c2, %c0_11, %c0_12] : memref<4x32x8xbf16, #tpu.memory_space<vmem>>, vector<1x32x8xbf16>
    %13 = vector.shape_cast %12 : vector<1x32x8xbf16> to vector<32x8xbf16>
    %cst_13 = arith.constant dense<0.000000e+00> : vector<8x8xf32>
    %14 = tpu.matmul %1, %13, %cst_13 {dimension_numbers = #tpu.dot_dimension_numbers<[1], [0], [0], [1], [0, 0, 1, 1], [], []>} : vector<8x32xbf16>, vector<32x8xbf16>, vector<8x8xf32> -> vector<8x8xf32>
    %c3 = arith.constant 3 : index
    %c0_14 = arith.constant 0 : index
    %c0_15 = arith.constant 0 : index
    %15 = vector.load %arg5[%c3, %c0_14, %c0_15] : memref<4x32x8xbf16, #tpu.memory_space<vmem>>, vector<1x32x8xbf16>
    %16 = vector.shape_cast %15 : vector<1x32x8xbf16> to vector<32x8xbf16>
    %cst_16 = arith.constant dense<0.000000e+00> : vector<8x8xf32>
    %17 = tpu.matmul %1, %16, %cst_16 {dimension_numbers = #tpu.dot_dimension_numbers<[1], [0], [0], [1], [0, 0, 1, 1], [], []>} : vector<8x32xbf16>, vector<32x8xbf16>, vector<8x8xf32> -> vector<8x8xf32>
    %c0_17 = arith.constant 0 : index
    %c0_18 = arith.constant 0 : index
    %c0_19 = arith.constant 0 : index
    %18 = vector.load %arg6[%c0_17, %c0_18, %c0_19] : memref<4x32x8xbf16, #tpu.memory_space<vmem>>, vector<1x32x8xbf16>
    %19 = vector.shape_cast %18 : vector<1x32x8xbf16> to vector<32x8xbf16>
    %cst_20 = arith.constant dense<0.000000e+00> : vector<8x8xf32>
    %20 = tpu.matmul %3, %19, %cst_20 {dimension_numbers = #tpu.dot_dimension_numbers<[1], [0], [0], [1], [0, 0, 1, 1], [], []>} : vector<8x32xbf16>, vector<32x8xbf16>, vector<8x8xf32> -> vector<8x8xf32>
    %c1_21 = arith.constant 1 : index
    %c0_22 = arith.constant 0 : index
    %c0_23 = arith.constant 0 : index
    %21 = vector.load %arg6[%c1_21, %c0_22, %c0_23] : memref<4x32x8xbf16, #tpu.memory_space<vmem>>, vector<1x32x8xbf16>
    %22 = vector.shape_cast %21 : vector<1x32x8xbf16> to vector<32x8xbf16>
    %cst_24 = arith.constant dense<0.000000e+00> : vector<8x8xf32>
    %23 = tpu.matmul %3, %22, %cst_24 {dimension_numbers = #tpu.dot_dimension_numbers<[1], [0], [0], [1], [0, 0, 1, 1], [], []>} : vector<8x32xbf16>, vector<32x8xbf16>, vector<8x8xf32> -> vector<8x8xf32>
    %c2_25 = arith.constant 2 : index
    %c0_26 = arith.constant 0 : index
    %c0_27 = arith.constant 0 : index
    %24 = vector.load %arg6[%c2_25, %c0_26, %c0_27] : memref<4x32x8xbf16, #tpu.memory_space<vmem>>, vector<1x32x8xbf16>
    %25 = vector.shape_cast %24 : vector<1x32x8xbf16> to vector<32x8xbf16>
    %cst_28 = arith.constant dense<0.000000e+00> : vector<8x8xf32>
    %26 = tpu.matmul %3, %25, %cst_28 {dimension_numbers = #tpu.dot_dimension_numbers<[1], [0], [0], [1], [0, 0, 1, 1], [], []>} : vector<8x32xbf16>, vector<32x8xbf16>, vector<8x8xf32> -> vector<8x8xf32>
    %c3_29 = arith.constant 3 : index
    %c0_30 = arith.constant 0 : index
    %c0_31 = arith.constant 0 : index
    %27 = vector.load %arg6[%c3_29, %c0_30, %c0_31] : memref<4x32x8xbf16, #tpu.memory_space<vmem>>, vector<1x32x8xbf16>
    %28 = vector.shape_cast %27 : vector<1x32x8xbf16> to vector<32x8xbf16>
    %cst_32 = arith.constant dense<0.000000e+00> : vector<8x8xf32>
    %29 = tpu.matmul %3, %28, %cst_32 {dimension_numbers = #tpu.dot_dimension_numbers<[1], [0], [0], [1], [0, 0, 1, 1], [], []>} : vector<8x32xbf16>, vector<32x8xbf16>, vector<8x8xf32> -> vector<8x8xf32>
    %c0_33 = arith.constant 0 : index
    %c0_34 = arith.constant 0 : index
    %c0_35 = arith.constant 0 : index
    %30 = vector.load %arg7[%c0_33, %c0_34, %c0_35] : memref<4x32x8xbf16, #tpu.memory_space<vmem>>, vector<1x32x8xbf16>
    %31 = vector.shape_cast %30 : vector<1x32x8xbf16> to vector<32x8xbf16>
    %cst_36 = arith.constant dense<0.000000e+00> : vector<8x8xf32>
    %32 = tpu.matmul %5, %31, %cst_36 {dimension_numbers = #tpu.dot_dimension_numbers<[1], [0], [0], [1], [0, 0, 1, 1], [], []>} : vector<8x32xbf16>, vector<32x8xbf16>, vector<8x8xf32> -> vector<8x8xf32>
    %c1_37 = arith.constant 1 : index
    %c0_38 = arith.constant 0 : index
    %c0_39 = arith.constant 0 : index
    %33 = vector.load %arg7[%c1_37, %c0_38, %c0_39] : memref<4x32x8xbf16, #tpu.memory_space<vmem>>, vector<1x32x8xbf16>
    %34 = vector.shape_cast %33 : vector<1x32x8xbf16> to vector<32x8xbf16>
    %cst_40 = arith.constant dense<0.000000e+00> : vector<8x8xf32>
    %35 = tpu.matmul %5, %34, %cst_40 {dimension_numbers = #tpu.dot_dimension_numbers<[1], [0], [0], [1], [0, 0, 1, 1], [], []>} : vector<8x32xbf16>, vector<32x8xbf16>, vector<8x8xf32> -> vector<8x8xf32>
    %c2_41 = arith.constant 2 : index
    %c0_42 = arith.constant 0 : index
    %c0_43 = arith.constant 0 : index
    %36 = vector.load %arg7[%c2_41, %c0_42, %c0_43] : memref<4x32x8xbf16, #tpu.memory_space<vmem>>, vector<1x32x8xbf16>
    %37 = vector.shape_cast %36 : vector<1x32x8xbf16> to vector<32x8xbf16>
    %cst_44 = arith.constant dense<0.000000e+00> : vector<8x8xf32>
    %38 = tpu.matmul %5, %37, %cst_44 {dimension_numbers = #tpu.dot_dimension_numbers<[1], [0], [0], [1], [0, 0, 1, 1], [], []>} : vector<8x32xbf16>, vector<32x8xbf16>, vector<8x8xf32> -> vector<8x8xf32>
    %c3_45 = arith.constant 3 : index
    %c0_46 = arith.constant 0 : index
    %c0_47 = arith.constant 0 : index
    %39 = vector.load %arg7[%c3_45, %c0_46, %c0_47] : memref<4x32x8xbf16, #tpu.memory_space<vmem>>, vector<1x32x8xbf16>
    %40 = vector.shape_cast %39 : vector<1x32x8xbf16> to vector<32x8xbf16>
    %cst_48 = arith.constant dense<0.000000e+00> : vector<8x8xf32>
    %41 = tpu.matmul %5, %40, %cst_48 {dimension_numbers = #tpu.dot_dimension_numbers<[1], [0], [0], [1], [0, 0, 1, 1], [], []>} : vector<8x32xbf16>, vector<32x8xbf16>, vector<8x8xf32> -> vector<8x8xf32>
    %42 = tpu.iota {dimensions = array<i32: 1>} : vector<8x8xi32>
    %c1_i32 = arith.constant 1 : i32
    %43 = arith.muli %arg0, %c1_i32 : i32
    %c0_i32 = arith.constant 0 : i32
    %44 = arith.addi %43, %c0_i32 : i32
    %45 = arith.index_cast %44 : i32 to index
    %46 = memref.load %arg1[%45] : memref<2xi32, #tpu.memory_space<smem>>
    %47 = vector.broadcast %46 : i32 to vector<8x8xi32>
    %48 = arith.cmpi slt, %42, %47 : vector<8x8xi32>
    %cst_49 = arith.constant 0.000000e+00 : f32
    %cst_50 = arith.constant -1.000000e+06 : f32
    %49 = vector.broadcast %cst_49 : f32 to vector<8x8xf32>
    %50 = vector.broadcast %cst_50 : f32 to vector<8x8xf32>
    %51 = arith.select %48, %49, %50 : vector<8x8xi1>, vector<8x8xf32>
    %cst_51 = arith.constant 0.000000e+00 : f32
    %52 = vector.broadcast %cst_51 : f32 to vector<8x32xf32>
    %53 = arith.truncf %8 : vector<8x8xf32> to vector<8x8xbf16>
    %54 = arith.truncf %20 : vector<8x8xf32> to vector<8x8xbf16>
    %55 = arith.truncf %32 : vector<8x8xf32> to vector<8x8xbf16>
    "tpu.trace_start"() <{level = 10 : i32, message = "qe,ke->qk"}> : () -> ()
    %cst_52 = arith.constant dense<0.000000e+00> : vector<8x8xf32>
    %56 = tpu.matmul %53, %54, %cst_52 {dimension_numbers = #tpu.dot_dimension_numbers<[1], [1], [0], [0], [0, 0, 1, 0], [], []>} : vector<8x8xbf16>, vector<8x8xbf16>, vector<8x8xf32> -> vector<8x8xf32>
    "tpu.trace_stop"() : () -> ()
    %cst_53 = arith.constant 0.353553385 : f32
    %57 = vector.broadcast %cst_53 : f32 to vector<8x8xf32>
    %58 = arith.mulf %56, %57 : vector<8x8xf32>
    %59 = arith.addf %58, %51 : vector<8x8xf32>
    %cst_54 = arith.constant dense<0xFF800000> : vector<8xf32>
    %60 = vector.multi_reduction <maximumf>, %59, %cst_54 [1] : vector<8x8xf32> to vector<8xf32>
    %61 = vector.shape_cast %60 : vector<8xf32> to vector<8x1xf32>
    %62 = vector.broadcast %61 : vector<8x1xf32> to vector<8x8xf32>
    %63 = arith.subf %59, %62 : vector<8x8xf32>
    %64 = math.exp %63 : vector<8x8xf32>
    %cst_55 = arith.constant dense<0.000000e+00> : vector<8xf32>
    %65 = vector.multi_reduction <add>, %64, %cst_55 [1] : vector<8x8xf32> to vector<8xf32>
    %66 = vector.shape_cast %65 : vector<8xf32> to vector<8x1xf32>
    %67 = tpu.reciprocal %66 {approx = true} : vector<8x1xf32> -> vector<8x1xf32>
    %68 = vector.broadcast %67 : vector<8x1xf32> to vector<8x8xf32>
    %69 = arith.mulf %64, %68 : vector<8x8xf32>
    %70 = arith.truncf %69 : vector<8x8xf32> to vector<8x8xbf16>
    %cst_56 = arith.constant dense<0.000000e+00> : vector<8x8xf32>
    %71 = tpu.matmul %70, %55, %cst_56 {dimension_numbers = #tpu.dot_dimension_numbers<[1], [0], [0], [1], [0, 0, 1, 1], [], []>} : vector<8x8xbf16>, vector<8x8xbf16>, vector<8x8xf32> -> vector<8x8xf32>
    %72 = arith.truncf %71 : vector<8x8xf32> to vector<8x8xbf16>
    %c0_57 = arith.constant 0 : index
    %c0_58 = arith.constant 0 : index
    %c0_59 = arith.constant 0 : index
    %73 = vector.load %arg8[%c0_57, %c0_58, %c0_59] : memref<4x8x32xbf16, #tpu.memory_space<vmem>>, vector<1x8x32xbf16>
    %74 = vector.shape_cast %73 : vector<1x8x32xbf16> to vector<8x32xbf16>
    %cst_60 = arith.constant dense<0.000000e+00> : vector<8x32xf32>
    %75 = tpu.matmul %72, %74, %cst_60 {dimension_numbers = #tpu.dot_dimension_numbers<[1], [0], [0], [1], [0, 0, 1, 1], [], []>} : vector<8x8xbf16>, vector<8x32xbf16>, vector<8x32xf32> -> vector<8x32xf32>
    %76 = arith.addf %52, %75 : vector<8x32xf32>
    %77 = arith.truncf %11 : vector<8x8xf32> to vector<8x8xbf16>
    %78 = arith.truncf %23 : vector<8x8xf32> to vector<8x8xbf16>
    %79 = arith.truncf %35 : vector<8x8xf32> to vector<8x8xbf16>
    "tpu.trace_start"() <{level = 10 : i32, message = "qe,ke->qk"}> : () -> ()
    %cst_61 = arith.constant dense<0.000000e+00> : vector<8x8xf32>
    %80 = tpu.matmul %77, %78, %cst_61 {dimension_numbers = #tpu.dot_dimension_numbers<[1], [1], [0], [0], [0, 0, 1, 0], [], []>} : vector<8x8xbf16>, vector<8x8xbf16>, vector<8x8xf32> -> vector<8x8xf32>
    "tpu.trace_stop"() : () -> ()
    %cst_62 = arith.constant 0.353553385 : f32
    %81 = vector.broadcast %cst_62 : f32 to vector<8x8xf32>
    %82 = arith.mulf %80, %81 : vector<8x8xf32>
    %83 = arith.addf %82, %51 : vector<8x8xf32>
    %cst_63 = arith.constant dense<0xFF800000> : vector<8xf32>
    %84 = vector.multi_reduction <maximumf>, %83, %cst_63 [1] : vector<8x8xf32> to vector<8xf32>
    %85 = vector.shape_cast %84 : vector<8xf32> to vector<8x1xf32>
    %86 = vector.broadcast %85 : vector<8x1xf32> to vector<8x8xf32>
    %87 = arith.subf %83, %86 : vector<8x8xf32>
    %88 = math.exp %87 : vector<8x8xf32>
    %cst_64 = arith.constant dense<0.000000e+00> : vector<8xf32>
    %89 = vector.multi_reduction <add>, %88, %cst_64 [1] : vector<8x8xf32> to vector<8xf32>
    %90 = vector.shape_cast %89 : vector<8xf32> to vector<8x1xf32>
    %91 = tpu.reciprocal %90 {approx = true} : vector<8x1xf32> -> vector<8x1xf32>
    %92 = vector.broadcast %91 : vector<8x1xf32> to vector<8x8xf32>
    %93 = arith.mulf %88, %92 : vector<8x8xf32>
    %94 = arith.truncf %93 : vector<8x8xf32> to vector<8x8xbf16>
    %cst_65 = arith.constant dense<0.000000e+00> : vector<8x8xf32>
    %95 = tpu.matmul %94, %79, %cst_65 {dimension_numbers = #tpu.dot_dimension_numbers<[1], [0], [0], [1], [0, 0, 1, 1], [], []>} : vector<8x8xbf16>, vector<8x8xbf16>, vector<8x8xf32> -> vector<8x8xf32>
    %96 = arith.truncf %95 : vector<8x8xf32> to vector<8x8xbf16>
    %c1_66 = arith.constant 1 : index
    %c0_67 = arith.constant 0 : index
    %c0_68 = arith.constant 0 : index
    %97 = vector.load %arg8[%c1_66, %c0_67, %c0_68] : memref<4x8x32xbf16, #tpu.memory_space<vmem>>, vector<1x8x32xbf16>
    %98 = vector.shape_cast %97 : vector<1x8x32xbf16> to vector<8x32xbf16>
    %cst_69 = arith.constant dense<0.000000e+00> : vector<8x32xf32>
    %99 = tpu.matmul %96, %98, %cst_69 {dimension_numbers = #tpu.dot_dimension_numbers<[1], [0], [0], [1], [0, 0, 1, 1], [], []>} : vector<8x8xbf16>, vector<8x32xbf16>, vector<8x32xf32> -> vector<8x32xf32>
    %100 = arith.addf %76, %99 : vector<8x32xf32>
    %101 = arith.truncf %14 : vector<8x8xf32> to vector<8x8xbf16>
    %102 = arith.truncf %26 : vector<8x8xf32> to vector<8x8xbf16>
    %103 = arith.truncf %38 : vector<8x8xf32> to vector<8x8xbf16>
    "tpu.trace_start"() <{level = 10 : i32, message = "qe,ke->qk"}> : () -> ()
    %cst_70 = arith.constant dense<0.000000e+00> : vector<8x8xf32>
    %104 = tpu.matmul %101, %102, %cst_70 {dimension_numbers = #tpu.dot_dimension_numbers<[1], [1], [0], [0], [0, 0, 1, 0], [], []>} : vector<8x8xbf16>, vector<8x8xbf16>, vector<8x8xf32> -> vector<8x8xf32>
    "tpu.trace_stop"() : () -> ()
    %cst_71 = arith.constant 0.353553385 : f32
    %105 = vector.broadcast %cst_71 : f32 to vector<8x8xf32>
    %106 = arith.mulf %104, %105 : vector<8x8xf32>
    %107 = arith.addf %106, %51 : vector<8x8xf32>
    %cst_72 = arith.constant dense<0xFF800000> : vector<8xf32>
    %108 = vector.multi_reduction <maximumf>, %107, %cst_72 [1] : vector<8x8xf32> to vector<8xf32>
    %109 = vector.shape_cast %108 : vector<8xf32> to vector<8x1xf32>
    %110 = vector.broadcast %109 : vector<8x1xf32> to vector<8x8xf32>
    %111 = arith.subf %107, %110 : vector<8x8xf32>
    %112 = math.exp %111 : vector<8x8xf32>
    %cst_73 = arith.constant dense<0.000000e+00> : vector<8xf32>
    %113 = vector.multi_reduction <add>, %112, %cst_73 [1] : vector<8x8xf32> to vector<8xf32>
    %114 = vector.shape_cast %113 : vector<8xf32> to vector<8x1xf32>
    %115 = tpu.reciprocal %114 {approx = true} : vector<8x1xf32> -> vector<8x1xf32>
    %116 = vector.broadcast %115 : vector<8x1xf32> to vector<8x8xf32>
    %117 = arith.mulf %112, %116 : vector<8x8xf32>
    %118 = arith.truncf %117 : vector<8x8xf32> to vector<8x8xbf16>
    %cst_74 = arith.constant dense<0.000000e+00> : vector<8x8xf32>
    %119 = tpu.matmul %118, %103, %cst_74 {dimension_numbers = #tpu.dot_dimension_numbers<[1], [0], [0], [1], [0, 0, 1, 1], [], []>} : vector<8x8xbf16>, vector<8x8xbf16>, vector<8x8xf32> -> vector<8x8xf32>
    %120 = arith.truncf %119 : vector<8x8xf32> to vector<8x8xbf16>
    %c2_75 = arith.constant 2 : index
    %c0_76 = arith.constant 0 : index
    %c0_77 = arith.constant 0 : index
    %121 = vector.load %arg8[%c2_75, %c0_76, %c0_77] : memref<4x8x32xbf16, #tpu.memory_space<vmem>>, vector<1x8x32xbf16>
    %122 = vector.shape_cast %121 : vector<1x8x32xbf16> to vector<8x32xbf16>
    %cst_78 = arith.constant dense<0.000000e+00> : vector<8x32xf32>
    %123 = tpu.matmul %120, %122, %cst_78 {dimension_numbers = #tpu.dot_dimension_numbers<[1], [0], [0], [1], [0, 0, 1, 1], [], []>} : vector<8x8xbf16>, vector<8x32xbf16>, vector<8x32xf32> -> vector<8x32xf32>
    %124 = arith.addf %100, %123 : vector<8x32xf32>
    %125 = arith.truncf %17 : vector<8x8xf32> to vector<8x8xbf16>
    %126 = arith.truncf %29 : vector<8x8xf32> to vector<8x8xbf16>
    %127 = arith.truncf %41 : vector<8x8xf32> to vector<8x8xbf16>
    "tpu.trace_start"() <{level = 10 : i32, message = "qe,ke->qk"}> : () -> ()
    %cst_79 = arith.constant dense<0.000000e+00> : vector<8x8xf32>
    %128 = tpu.matmul %125, %126, %cst_79 {dimension_numbers = #tpu.dot_dimension_numbers<[1], [1], [0], [0], [0, 0, 1, 0], [], []>} : vector<8x8xbf16>, vector<8x8xbf16>, vector<8x8xf32> -> vector<8x8xf32>
    "tpu.trace_stop"() : () -> ()
    %cst_80 = arith.constant 0.353553385 : f32
    %129 = vector.broadcast %cst_80 : f32 to vector<8x8xf32>
    %130 = arith.mulf %128, %129 : vector<8x8xf32>
    %131 = arith.addf %130, %51 : vector<8x8xf32>
    %cst_81 = arith.constant dense<0xFF800000> : vector<8xf32>
    %132 = vector.multi_reduction <maximumf>, %131, %cst_81 [1] : vector<8x8xf32> to vector<8xf32>
    %133 = vector.shape_cast %132 : vector<8xf32> to vector<8x1xf32>
    %134 = vector.broadcast %133 : vector<8x1xf32> to vector<8x8xf32>
    %135 = arith.subf %131, %134 : vector<8x8xf32>
    %136 = math.exp %135 : vector<8x8xf32>
    %cst_82 = arith.constant dense<0.000000e+00> : vector<8xf32>
    %137 = vector.multi_reduction <add>, %136, %cst_82 [1] : vector<8x8xf32> to vector<8xf32>
    %138 = vector.shape_cast %137 : vector<8xf32> to vector<8x1xf32>
    %139 = tpu.reciprocal %138 {approx = true} : vector<8x1xf32> -> vector<8x1xf32>
    %140 = vector.broadcast %139 : vector<8x1xf32> to vector<8x8xf32>
    %141 = arith.mulf %136, %140 : vector<8x8xf32>
    %142 = arith.truncf %141 : vector<8x8xf32> to vector<8x8xbf16>
    %cst_83 = arith.constant dense<0.000000e+00> : vector<8x8xf32>
    %143 = tpu.matmul %142, %127, %cst_83 {dimension_numbers = #tpu.dot_dimension_numbers<[1], [0], [0], [1], [0, 0, 1, 1], [], []>} : vector<8x8xbf16>, vector<8x8xbf16>, vector<8x8xf32> -> vector<8x8xf32>
    %144 = arith.truncf %143 : vector<8x8xf32> to vector<8x8xbf16>
    %c3_84 = arith.constant 3 : index
    %c0_85 = arith.constant 0 : index
    %c0_86 = arith.constant 0 : index
    %145 = vector.load %arg8[%c3_84, %c0_85, %c0_86] : memref<4x8x32xbf16, #tpu.memory_space<vmem>>, vector<1x8x32xbf16>
    %146 = vector.shape_cast %145 : vector<1x8x32xbf16> to vector<8x32xbf16>
    %cst_87 = arith.constant dense<0.000000e+00> : vector<8x32xf32>
    %147 = tpu.matmul %144, %146, %cst_87 {dimension_numbers = #tpu.dot_dimension_numbers<[1], [0], [0], [1], [0, 0, 1, 1], [], []>} : vector<8x8xbf16>, vector<8x32xbf16>, vector<8x32xf32> -> vector<8x32xf32>
    %148 = arith.addf %124, %147 : vector<8x32xf32>
    %c0_88 = arith.constant 0 : index
    %c0_89 = arith.constant 0 : index
    %149 = vector.load %arg9[%c0_88, %c0_89] : memref<8x32xf32, #tpu.memory_space<vmem>>, vector<8x32xf32>
    tpu.vector_store %arg9[%c0_88, %c0_89], %148 {strides = array<i32>} : memref<8x32xf32, #tpu.memory_space<vmem>>, vector<8x32xf32>,
    return
  }
  func.func @transform_0(%arg0: i32, %arg1: memref<2xi32, #tpu.memory_space<smem>>) -> (i32, i32) {
    %c0_i32 = arith.constant 0 : i32
    %c0_i32_0 = arith.constant 0 : i32
    return %arg0, %c0_i32 : i32, i32
  }
  func.func @transform_1(%arg0: i32, %arg1: memref<2xi32, #tpu.memory_space<smem>>) -> (i32, i32) {
    %c0_i32 = arith.constant 0 : i32
    %c0_i32_0 = arith.constant 0 : i32
    return %arg0, %c0_i32 : i32, i32
  }
  func.func @transform_2(%arg0: i32, %arg1: memref<2xi32, #tpu.memory_space<smem>>) -> (i32, i32) {
    %c0_i32 = arith.constant 0 : i32
    %c0_i32_0 = arith.constant 0 : i32
    return %arg0, %c0_i32 : i32, i32
  }
  func.func @transform_3(%arg0: i32, %arg1: memref<2xi32, #tpu.memory_space<smem>>) -> (i32, i32, i32) {
    %c0_i32 = arith.constant 0 : i32
    %c0_i32_0 = arith.constant 0 : i32
    %c0_i32_1 = arith.constant 0 : i32
    %c0_i32_2 = arith.constant 0 : i32
    return %c0_i32, %c0_i32_0, %c0_i32_1 : i32, i32, i32
  }
  func.func @transform_4(%arg0: i32, %arg1: memref<2xi32, #tpu.memory_space<smem>>) -> (i32, i32, i32) {
    %c0_i32 = arith.constant 0 : i32
    %c0_i32_0 = arith.constant 0 : i32
    %c0_i32_1 = arith.constant 0 : i32
    %c0_i32_2 = arith.constant 0 : i32
    return %c0_i32, %c0_i32_0, %c0_i32_1 : i32, i32, i32
  }
  func.func @transform_5(%arg0: i32, %arg1: memref<2xi32, #tpu.memory_space<smem>>) -> (i32, i32, i32) {
    %c0_i32 = arith.constant 0 : i32
    %c0_i32_0 = arith.constant 0 : i32
    %c0_i32_1 = arith.constant 0 : i32
    %c0_i32_2 = arith.constant 0 : i32
    return %c0_i32, %c0_i32_0, %c0_i32_1 : i32, i32, i32
  }
  func.func @transform_6(%arg0: i32, %arg1: memref<2xi32, #tpu.memory_space<smem>>) -> (i32, i32, i32) {
    %c0_i32 = arith.constant 0 : i32
    %c0_i32_0 = arith.constant 0 : i32
    %c0_i32_1 = arith.constant 0 : i32
    %c0_i32_2 = arith.constant 0 : i32
    return %c0_i32, %c0_i32_0, %c0_i32_1 : i32, i32, i32
  }
  func.func @transform_7(%arg0: i32, %arg1: memref<2xi32, #tpu.memory_space<smem>>) -> (i32, i32) {
    %c0_i32 = arith.constant 0 : i32
    %c0_i32_0 = arith.constant 0 : i32
    return %arg0, %c0_i32 : i32, i32
  }
}

</mosaic_0001>

<bundles_post_ra>
// kernel: tpu_custom_call.1
= control target key start
LH: loop header
LB: loop body
LE: loop exit
PB: predicated region body
PF: predicated region fallthrough
CT: control target
= control target key end

     0   :  { %s2648_s0 = inlined_call_operand.vmem [shape: s32[2], index: 0, kind: input, shape index: {}]   ;;  %s2649_s1 = inlined_call_operand.vmem [shape: f32[16,32], index: 1, kind: input, shape index: {}]   ;;  %s2650_s2 = inlined_call_operand.vmem [shape: f32[16,32], index: 2, kind: input, shape index: {}]   ;;  %s2651_s3 = inlined_call_operand.vmem [shape: f32[16,32], index: 3, kind: input, shape index: {}]   ;;  %s2652_s4 = inlined_call_operand.vmem [shape: bf16[4,32,8], index: 4, kind: input, shape index: {}]   ;;  %s2653_s5 = inlined_call_operand.vmem [shape: bf16[4,32,8], index: 5, kind: input, shape index: {}]   ;;  %s2654_s6 = inlined_call_operand.vmem [shape: bf16[4,32,8], index: 6, kind: input, shape index: {}]   ;;  %s2655_s7 = inlined_call_operand.vmem [shape: bf16[4,8,32], index: 7, kind: input, shape index: {}]   ;;  %s2656_s8 = inlined_call_operand.hbm [shape: f32[16,32], index: 8, kind: output, shape index: {}]  }
   0x1   :  { %s13_s29 = sshll.u32 %s2648_s0, 4  ;;  %s14_s29 = int_to_ptr.vmem [resolvable:$true] %s13_s29 }
   0x2   :  { %s2162_s30 = scalar_lea.vmem %s14_s29, 16  ;;  %p2167_p1 = scmp.lt.s32.totalorder %s14_s29, %s14_s29 }
   0x3   :  { %p2163_p0 = scmp.ne.s32.totalorder %s14_s29, %s2162_s30  ;;  %p2168_p2 = scmp.lt.s32.totalorder %s2162_s30, %s2162_s30 }
   0x5   :  { %p2169_p3 = por %p2168_p2, %p2167_p1 }
   0x7   :  { %p2170_p4 = pnand %p2169_p3, %p2163_p0 }
   0x9   :  { %2173 = shalt.err (!%p2170_p4)  }
   0xa   :  { %s2238_s9 = smov [#allocation3]  }
   0xb   :  { %16 = dma.vmem_to_smem %s14_s29, 16, %s2238_s9, [#allocation2] }
   0xc   :  { %2216 = dma.done.wait [#allocation2], 16 }
   0xd   :  { %2217 = vsyncadd [#allocation2], 4294967280 }
   0xe   :  { %18 = sfence }
   0xf   :  { %19 = vsyncpa [#allocation5], 0 }
  0x10   :  { %21 = vsyncpa [#allocation5 + $0x1], 0  ;;  %s2291_s10 = smov 0   ;;  %s2293_s11 = smov 0  }
  0x11   :  { %s2295_s0 = smov 0   ;;  %s2297_s12 = smov 0  }
  0x12 LB: > { %s2312_s13 = sadd.s32 4294967295, %s2236_s12   ;;  %s1752_s14 = sadd.s32 4294967294, %s2236_s12   ;;  %s2236_s12 = sphi %s2297_s12, %s2662_s12   ;;  %s2232_s0 = sphi %s2295_s0, %s2661_s0   ;;  %s2228_s11 = sphi %s2293_s11, %s2660_s11   ;;  %s2224_s10 = sphi %s2291_s10, %s2659_s10  }
  0x13   : > { %s2316_s15 = sadd.s32 1, %s2236_s12   ;;  %s196_s16 = sadd.s32 1, %s2232_s0 }
  0x14   : > { %s193_s17 = ssub.s32 %s2236_s12, %s2316_s15  ;;  %p206_p5 = scmp.ne.s32.totalorder %s2232_s0, %s2228_s11 }
  0x15   : > { %p194_p6 = scmp.eq.s32.totalorder %s193_s17, 0  ;;  %p207_p7 = scmp.eq.s32.totalorder %s2312_s13, 1 }
  0x16   : > { %p212_p8 = scmp.ne.s32.totalorder %s2228_s11, %s2224_s10  ;;  %p213_p9 = scmp.eq.s32.totalorder %s1752_s14, 1 }
  0x17   : > { %s2327_s18 = scalar_select %p194_p6, %s2232_s0, %s196_s16  }
  0x18   : > { %p2329_p10 = por %p207_p7, %p206_p5  ;;  %p2333_p11 = por %p213_p9, %p212_p8 }
  0x19   : > { %p1755_p12 = scmp.ge.s32.totalorder %s2236_s12, 1  ;;  %p264_p13 = scmp.lt.s32.totalorder %s2236_s12, 3 }
  0x1b   : > { %p265_p0 = pnand %p1755_p12, %p264_p13 }
  0x1c   : > { %p303_p1 = scmp.lt.s32.totalorder (!%p265_p0), %s2312_s13, 1  ;;  %s1015_s26 = sld [smem:[#allocation3 + %s2312_s13]] (!%p265_p0) }
  0x1d   : > { %268 = sbr.rel (%p265_p0) target bundleno = 2418 (0x972), region = 48 }
  0x22   : > { %v2122_v0 = vld [vmem:[%s2652_s4 + $0x8] sm:$0xff]   ;;  %v2239_v1 = vmov 0.0   ;;  %v2123_v2 = vld [vmem:[%s2652_s4 + $0x18] sm:$0xff]   ;;  %v2124_v3 = vld [vmem:[%s2652_s4] sm:$0xff]   ;;  %vm2240_vm0 = vmmov 0   ;;  %s304_s29 = scalar_select %p303_p1, %s2312_s13, 1 }
  0x23   : > { %1911 = vmatprep.subr.bf16.mxu0 %v2239_v1  ;;  %1919 = vmatprep.subr.bf16.mxu1 %v2239_v1  ;;  %v2125_v4 = vld [vmem:[%s2652_s4 + $0x10] sm:$0xff]   ;;  %v2126_v5 = vld [vmem:[%s2652_s4 + $0x28] sm:$0xff]   ;;  %v2127_v6 = vld [vmem:[%s2652_s4 + $0x38] sm:$0xff]   ;;  %vm338_vm1 = vcmask 261120   ;;  %vm1022_vm2 = vcmask 64512   ;;  %vm1086_vm3 = vcmask 1043456  }
  0x24   : > { %1912 = vmatpush3.bf16.msra.mxu0 %v2122_v0  ;;  %1915 = vmatprep.mubr.msk.bf16.mxu0 %vm2240_vm0, %v2239_v1  ;;  %s2361_s30 = sshll.u32 %s304_s29, 3  ;;  %v2128_v9 = vld [vmem:[%s2652_s4 + $0x20] sm:$0xff]   ;;  %v2129_v10 = vld [vmem:[%s2652_s4 + $0x30] sm:$0xff]   ;;  %v2130_v11 = vld [vmem:[%s2653_s5 + $0x8] sm:$0xff]   ;;  %s2242_s29 = smov [#allocation4]  }
  0x25   : > { %1920 = vmatpush3.bf16.msra.mxu1 %v2123_v2  ;;  %1913 = vmatprep.subr.bf16.mxu0 %v2239_v1  ;;  %s306_s21 = scalar_lea.vmem %s2649_s1, %s2361_s30  ;;  %v2131_v12 = vld [vmem:[%s2653_s5 + $0x18] sm:$0xff]   ;;  %v2132_v13 = vld [vmem:[%s2653_s5] sm:$0xff]   ;;  %v2133_v14 = vld [vmem:[%s2653_s5 + $0x10] sm:$0xff]   ;;  %s314_s23 = scalar_lea.vmem %s2651_s3, %s2361_s30 }
  0x26   : > { %1921 = vmatprep.subr.bf16.mxu1 %v2239_v1  ;;  %1923 = vmatprep.mubr.msk.bf16.mxu1 %vm2240_vm0, %v2239_v1  ;;  %v316_v7 = vld [vmem:[%s306_s21] sm:$0xff]  ;;  %s310_s21 = scalar_lea.vmem %s2650_s2, %s2361_s30  ;;  %v2134_v17 = vld [vmem:[%s2653_s5 + $0x28] sm:$0xff]   ;;  %v2140_v25 = vld [vmem:[%s2653_s5 + $0x38] sm:$0xff]   ;;  %s2178_s9 = sshll.u32 %s2242_s29, 4  ;;  %s2179_s9 = int_to_ptr.vmem [resolvable:$false] %s2178_s9 }
  0x27   : > { %v317_v8 = vpack.c.bf16 %v316_v7, %v316_v7  ;;  %v318_v15 = vld [vmem:[%s310_s21] sm:$0xff]  ;;  %v2136_v19 = vld [vmem:[%s2654_s6 + $0x8] sm:$0xff]   ;;  %v2141_v26 = vld [vmem:[%s2653_s5 + $0x30] sm:$0xff]   ;;  %s300_s21 = sand.u32 1, %s2228_s11   ;;  %s2180_s14 = scalar_lea.vmem %s2179_s9, 256 }
  0x28   : > { %1914 = vmatpush3.bf16.msra.mxu0 %v2124_v3  ;;  %v319_v16 = vpack.c.bf16 %v318_v15, %v318_v15  ;;  %v2135_v18 = vld [vmem:[%s2653_s5 + $0x20] sm:$0xff]   ;;  %v2138_v23 = vld [vmem:[%s2654_s6 + $0x28] sm:$0xff]   ;;  %v2142_v27 = vld [vmem:[%s2654_s6 + $0x18] sm:$0xff]   ;;  %s1756_s22 = sshll.u32 %s300_s21, 3  ;;  %s1656_s28 = scalar_lea.sflag [#allocation5], %s300_s21 }
  0x29   : > { %1922 = vmatpush3.bf16.msra.mxu1 %v2125_v4  ;;  %1927 = vmatprep.subr.bf16.mxu0 %v2239_v1  ;;  %v2137_v20 = vld [vmem:[%s2654_s6] sm:$0xff]   ;;  %v2143_v28 = vld [vmem:[%s2654_s6 + $0x10] sm:$0xff]   ;;  %v2144_v29 = vld [vmem:[%s2654_s6 + $0x38] sm:$0xff]   ;;  %s302_s24 = scalar_lea.vmem [#allocation4], %s1756_s22 }
  0x2a   : > { %1935 = vmatprep.subr.bf16.mxu1 %v2239_v1  ;;  %v320_v21 = vld [vmem:[%s314_s23] sm:$0xff]  ;;  %v2145_v30 = vld [vmem:[%s2654_s6 + $0x30] sm:$0xff]   ;;  %s1848_s23 = sshll.u32 %s2312_s13, 7  ;;  %s1669_s25 = sshll.u32 %s302_s24, 4  ;;  %s2608_s25 = int_to_ptr.vmem [resolvable:$true] %s1669_s25 }
  0x2b   : > { %1916 = vmatmul.mubr.msk.bf16.vlgmr.msra.gmra.mxu0 %vm338_vm1, %v317_v8  ;;  %v321_v22 = vpack.c.bf16 %v320_v21, %v320_v21  ;;  %v2139_v24 = vld [vmem:[%s2654_s6 + $0x20] sm:$0xff]   ;;  %s2606_s30 = scalar_lea.hbm %s2656_s8, %s1848_s23  ;;  %s2174_s13 = scalar_lea.vmem %s2608_s25, 128 }
  0x2c   : > { %1924 = vmatmul.mubr.msk.bf16.vlgmr.msra.gmra.mxu1 %vm338_vm1, %v317_v8  ;;  %1928 = vmatpush3.bf16.msra.mxu0 %v2126_v5  ;;  %p2175_p2 = scmp.ne.s32.totalorder %s2608_s25, %s2174_s13  ;;  %p2181_p5 = scmp.lt.s32.totalorder %s2608_s25, %s2179_s9 }
  0x2d   : > { %1936 = vmatpush3.bf16.msra.mxu1 %v2127_v6  ;;  %1929 = vmatprep.subr.bf16.mxu0 %v2239_v1  ;;  %p2182_p6 = scmp.lt.s32.totalorder %s2180_s14, %s2174_s13 }
  0x2e   : > { %1937 = vmatprep.subr.bf16.mxu1 %v2239_v1  ;;  %1931 = vmatprep.mubr.msk.bf16.mxu0 %vm2240_vm0, %v2239_v1  ;;  %p2176_p3 = pnand %p2175_p2, %p2329_p10 }
  0x2f   : > { %1939 = vmatprep.mubr.msk.bf16.mxu1 %vm2240_vm0, %v2239_v1  ;;  %p2183_p7 = por %p2182_p6, %p2181_p5 }
  0x30   : > { %1930 = vmatpush3.bf16.msra.mxu0 %v2128_v9  ;;  %p2177_p4 = pneg %p2176_p3 }
  0x31   : > { %1938 = vmatpush3.bf16.msra.mxu1 %v2129_v10  ;;  %1943 = vmatprep.subr.bf16.mxu0 %v2239_v1 }
  0x32   : > { %1951 = vmatprep.subr.bf16.mxu1 %v2239_v1  ;;  %p2184_p8 = pnand %p2183_p7, %p2177_p4 }
  0x33   : > { %1932 = vmatmul.mubr.msk.bf16.vlgmr.msra.gmra.mxu0 %vm338_vm1, %v317_v8 }
  0x34   : > { %1940 = vmatmul.mubr.msk.bf16.vlgmr.msra.gmra.mxu1 %vm338_vm1, %v317_v8  ;;  %1944 = vmatpush3.bf16.msra.mxu0 %v2130_v11 }
  0x35   : > { %1952 = vmatpush3.bf16.msra.mxu1 %v2131_v12  ;;  %1945 = vmatprep.subr.bf16.mxu0 %v2239_v1  ;;  %v1013_v12 = vlaneseq }
  0x36   : > { %1953 = vmatprep.subr.bf16.mxu1 %v2239_v1  ;;  %1947 = vmatprep.mubr.msk.bf16.mxu0 %vm2240_vm0, %v2239_v1 }
  0x37   : > { %1955 = vmatprep.mubr.msk.bf16.mxu1 %vm2240_vm0, %v2239_v1 }
  0x38   : > { %1946 = vmatpush3.bf16.msra.mxu0 %v2132_v13  ;;  %v1014_v13 = vand.u32 127, %v1013_v12 }
  0x39   : > { %1954 = vmatpush3.bf16.msra.mxu1 %v2133_v14  ;;  %1959 = vmatprep.subr.bf16.mxu0 %v2239_v1  ;;  %v1016_v14 = vstv %s1015_s26 }
  0x3a   : > { %1967 = vmatprep.subr.bf16.mxu1 %v2239_v1  ;;  %vm1017_vm4 = vcmp.lt.s32.totalorder %v1014_v13, %v1016_v14 }
  0x3b   : > { %1948 = vmatmul.mubr.msk.bf16.vlgmr.msra.gmra.mxu0 %vm338_vm1, %v319_v16 }
  0x3c   : > { %1956 = vmatmul.mubr.msk.bf16.vlgmr.msra.gmra.mxu1 %vm338_vm1, %v319_v16  ;;  %1960 = vmatpush3.bf16.msra.mxu0 %v2134_v17 }
  0x3d   : > { %1963 = vmatprep.mubr.msk.bf16.mxu0 %vm2240_vm0, %v2239_v1  ;;  %1961 = vmatprep.subr.bf16.mxu0 %v2239_v1 }
  0x3e   : > { %1971 = vmatprep.mubr.msk.bf16.mxu1 %vm2240_vm0, %v2239_v1  ;;  %1968 = vmatpush3.bf16.msra.mxu1 %v2140_v25 }
  0x3f   : > { %1969 = vmatprep.subr.bf16.mxu1 %v2239_v1 }
  0x40   : > { %1962 = vmatpush3.bf16.msra.mxu0 %v2135_v18 }
  0x41   : > { %1975 = vmatprep.subr.bf16.mxu0 %v2239_v1 }
  0x42   : > { %1970 = vmatpush3.bf16.msra.mxu1 %v2141_v26 }
  0x43   : > { %1964 = vmatmul.mubr.msk.bf16.vlgmr.msra.gmra.mxu0 %vm338_vm1, %v319_v16  ;;  %1983 = vmatprep.subr.bf16.mxu1 %v2239_v1 }
  0x44   : > { %1976 = vmatpush3.bf16.msra.mxu0 %v2136_v19  ;;  %1979 = vmatprep.mubr.msk.bf16.mxu0 %vm2240_vm0, %v2239_v1 }
  0x45   : > { %1977 = vmatprep.subr.bf16.mxu0 %v2239_v1  ;;  %1972 = vmatmul.mubr.msk.bf16.vlgmr.msra.gmra.mxu1 %vm338_vm1, %v319_v16  ;;  %v2241_v16 = vmov -1000000.0  }
  0x46   : > { %1984 = vmatpush3.bf16.msra.mxu1 %v2142_v27  ;;  %1987 = vmatprep.mubr.msk.bf16.mxu1 %vm2240_vm0, %v2239_v1  ;;  %v2514_v17 = vsel %vm1017_vm4, 0.0, %v2241_v16 }
  0x47   : > { %1985 = vmatprep.subr.bf16.mxu1 %v2239_v1 }
  0x48   : > { %1978 = vmatpush3.bf16.msra.mxu0 %v2137_v20 }
  0x49   : > { %1991 = vmatprep.subr.bf16.mxu0 %v2239_v1 }
  0x4a   : > { %1986 = vmatpush3.bf16.msra.mxu1 %v2143_v28 }
  0x4b   : > { %1980 = vmatmul.mubr.msk.bf16.vlgmr.msra.gmra.mxu0 %vm338_vm1, %v321_v22  ;;  %1999 = vmatprep.subr.bf16.mxu1 %v2239_v1 }
  0x4c   : > { %1992 = vmatpush3.bf16.msra.mxu0 %v2138_v23  ;;  %1995 = vmatprep.mubr.msk.bf16.mxu0 %vm2240_vm0, %v2239_v1 }
  0x4d   : > { %1993 = vmatprep.subr.bf16.mxu0 %v2239_v1  ;;  %1988 = vmatmul.mubr.msk.bf16.vlgmr.msra.gmra.mxu1 %vm338_vm1, %v321_v22 }
  0x4e   : > { %2003 = vmatprep.mubr.msk.bf16.mxu1 %vm2240_vm0, %v2239_v1  ;;  %2000 = vmatpush3.bf16.msra.mxu1 %v2144_v29 }
  0x4f   : > { %2001 = vmatprep.subr.bf16.mxu1 %v2239_v1 }
  0x50   : > { %1994 = vmatpush3.bf16.msra.mxu0 %v2139_v24 }
  0x51   : > { %2007 = vmatprep.subr.bf16.mxu0 %v2239_v1 }
  0x52   : > { %2002 = vmatpush3.bf16.msra.mxu1 %v2145_v30 }
  0x53   : > { %1996 = vmatmul.mubr.msk.bf16.vlgmr.msra.gmra.mxu0 %vm338_vm1, %v321_v22  ;;  %2013 = vmatprep.subr.bf16.mxu1 %v2239_v1 }
  0x54   : > { %2009 = vmatprep.mubr.msk.bf16.mxu0 %vm2240_vm0, %v2239_v1 }
  0x55   : > { %2004 = vmatmul.mubr.msk.bf16.vlgmr.msra.gmra.mxu1 %vm338_vm1, %v321_v22 }
  0x56   : > { %2015 = vmatprep.mubr.msk.bf16.mxu1 %vm2240_vm0, %v2239_v1 }
  0xeb   : > { %v376_v31 = vpop.f32.mrf.mxu0 }
  0xec   : > { %v433_v32 = vpop.f32.mrf.mxu1  ;;  %v1019_v59 = vpack.c.bf16 %v376_v31, %v376_v31 }
  0xed   : > { %v1917_v33 = vpop.f32.mrf.mxu0  ;;  %v1132_v0 = vpack.c.bf16 %v433_v32, %v433_v32 }
  0xee   : > { %v1925_v34 = vpop.f32.mrf.mxu1 }
  0xef   : > { %v379_v35 = vpop.f32.mrf.mxu0 }
  0xf0   : > { %v436_v36 = vpop.f32.mrf.mxu1 }
  0xf1   : > { %v1918_v37 = vpop.f32.mrf.mxu0 }
  0xf2   : > { %v1926_v38 = vpop.f32.mrf.mxu1 }
  0xf3   : > { %v2493_v39 = vpop.f32.mrf.mxu0 }
  0xf4   : > { %v2495_v40 = vpop.f32.mrf.mxu1 }
  0xf5   : > { %v1933_v41 = vpop.f32.mrf.mxu0 }
  0xf6   : > { %v1941_v42 = vpop.f32.mrf.mxu1 }
  0xf7   : > { %v493_v43 = vpop.f32.mrf.mxu0 }
  0xf8   : > { %v550_v44 = vpop.f32.mrf.mxu1 }
  0xf9   : > { %v1934_v45 = vpop.f32.mrf.mxu0 }
  0xfa   : > { %v1942_v46 = vpop.f32.mrf.mxu1 }
  0xfb   : > { %v606_v47 = vpop.f32.mrf.mxu0 }
  0xfc   : > { %v663_v48 = vpop.f32.mrf.mxu1  ;;  %v1020_v49 = vpack.c.bf16 %v606_v47, %v606_v47 }
  0xfd   : > { %v1949_v50 = vpop.f32.mrf.mxu0  ;;  %v1133_v55 = vpack.c.bf16 %v663_v48, %v663_v48 }
  0xfe   : > { %v1957_v51 = vpop.f32.mrf.mxu1  ;;  %v1027_v52 = vsel %vm1022_vm2, %v1020_v49, 0 }
  0xff   : > { %v609_v53 = vpop.f32.mrf.mxu0  ;;  %2008 = vmatpush3.bf16.xpose.msra.mxu0 %v1027_v52  ;;  %v1139_v60 = vsel %vm1022_vm2, %v1133_v55, 0 }
 0x100   : > { %v666_v54 = vpop.f32.mrf.mxu1  ;;  %2019 = vmatprep.subr.bf16.mxu0 %v2239_v1 }
 0x101   : > { %v1950_v56 = vpop.f32.mrf.mxu0 }
 0x102   : > { %v1958_v57 = vpop.f32.mrf.mxu1 }
 0x103   : > { %v2499_v58 = vpop.f32.mrf.mxu0 }
 0x105   : > { %v1965_v61 = vpop.f32.mrf.mxu0  ;;  %v2522_v43 = vpop.f32.mrf.mxu1 }
 0x106   : > { %2010 = vmatmul.mubr.msk.bf16.vlgmr.msra.gmra.mxu0 %vm1022_vm2, %v1019_v59 }
 0x107   : > { %2020 = vmatpush3.bf16.xpose.msra.mxu0 %v1139_v60  ;;  %2021 = vmatprep.mubr.msk.bf16.mxu0 %vm2240_vm0, %v2239_v1  ;;  %v723_v62 = vpop.f32.mrf.mxu0  ;;  %v1973_v44 = vpop.f32.mrf.mxu1 }
 0x108   : > { %2031 = vmatprep.subr.bf16.mxu0 %v2239_v1 }
 0x109   : > { %v1966_v63 = vpop.f32.mrf.mxu0  ;;  %v780_v45 = vpop.f32.mrf.mxu1 }
 0x10a   : > { %v1841_v45 = vld [vmem:[%s2655_s7 + $0x8] sm:$0xf] }
 0x10b   : > { %v836_v2 = vpop.f32.mrf.mxu0  ;;  %v1974_v46 = vpop.f32.mrf.mxu1 }
 0x10c   : > { %v1021_v3 = vpack.c.bf16 %v836_v2, %v836_v2  ;;  %v1452_v46 = vsel %vm1086_vm3, %v1841_v45, 0 }
 0x10d   : > { %v1981_v4 = vpop.f32.mrf.mxu0  ;;  %v893_v47 = vpop.f32.mrf.mxu1 }
 0x10e   : > { %2022 = vmatmul.mubr.msk.bf16.vlgmr.msra.gmra.mxu0 %vm1022_vm2, %v1132_v0  ;;  %v1088_v5 = vsel %vm1086_vm3, %v1021_v3, 0  ;;  %v1134_v57 = vpack.c.bf16 %v893_v47, %v893_v47  ;;  %v1131_v0 = vld [vmem:[%s2655_s7] sm:$0xf] }
 0x10f   : > { %2033 = vmatprep.mubr.msk.bf16.mxu0 %vm2240_vm0, %v2239_v1  ;;  %v839_v6 = vpop.f32.mrf.mxu0  ;;  %2014 = vmatpush3.bf16.msra.mxu1 %v1088_v5  ;;  %v1989_v48 = vpop.f32.mrf.mxu1  ;;  %v1294_v4 = vsel %vm1086_vm3, %v1131_v0, 0  ;;  %v1836_v5 = vld [vmem:[%s2655_s7 + $0x4] sm:$0xf] }
 0x110   : > { %2025 = vmatprep.subr.bf16.mxu1 %v2239_v1  ;;  %v1199_v61 = vsel %vm1086_vm3, %v1134_v57, 0  ;;  %v1248_v6 = vsel %vm1086_vm3, %v1836_v5, 0 }
 0x111   : > { %v1982_v7 = vpop.f32.mrf.mxu0  ;;  %v896_v49 = vpop.f32.mrf.mxu1  ;;  %2032 = vmatpush3.bf16.msra.mxu0 %v1248_v6 }
 0x112   : > { %2043 = vmatprep.subr.bf16.mxu0 %v2239_v1  ;;  %v1496_v49 = vpack.c.bf16 %v2522_v43, %v2522_v43 }
 0x113   : > { %v2511_v8 = vpop.f32.mrf.mxu0  ;;  %v1990_v50 = vpop.f32.mrf.mxu1 }
 0x114   : > { %v1338_v7 = vpack.c.bf16 %v2511_v8, %v2511_v8 }
 0x115   : > { %v1997_v9 = vpop.f32.mrf.mxu0  ;;  %v2524_v51 = vpop.f32.mrf.mxu1 }
 0x116   : > { %v1403_v12 = vsel %vm1086_vm3, %v1338_v7, 0  ;;  %v1497_v43 = vpack.c.bf16 %v2524_v51, %v2524_v51 }
 0x117   : > { %v953_v10 = vpop.f32.mrf.mxu0  ;;  %v2005_v52 = vpop.f32.mrf.mxu1 }
 0x119   : > { %v1998_v11 = vpop.f32.mrf.mxu0  ;;  %v1010_v53 = vpop.f32.mrf.mxu1 }
 0x11a   : > { %v1502_v53 = vsel %vm1022_vm2, %v1496_v49, 0 }
 0x11b   : > { %v2006_v54 = vpop.f32.mrf.mxu1 }
 0x11c   : > { %v1495_v54 = vpack.c.bf16 %v2495_v40, %v2495_v40 }
 0x1c6   : > { %v1063_v15 = vpop.f32.mrf.mxu0 }
 0x1c7   : > { %v1069_v18 = vmul.f32 0.35355338, %v1063_v15  ;;  %v1337_v15 = vpack.c.bf16 %v2499_v58, %v2499_v58 }
 0x1c8   : > { %v2011_v19 = vpop.f32.mrf.mxu0 }
 0x1c9   : > { %v1070_v20 = vadd.f32 %v1069_v18, %v2514_v17  ;;  %v1343_v19 = vsel %vm1022_vm2, %v1337_v15, 0 }
 0x1ca   : > { %v1066_v21 = vpop.f32.mrf.mxu0 }
 0x1cb   : > { %v1071_v22 = vsel %vm1022_vm2, %v1070_v20, -inf }
 0x1cc   : > { %1072 = vmax.xlane.f32.xlu0 %v1071_v22  ;;  %v2012_v23 = vpop.f32.mrf.mxu0  ;;  %v1336_v22 = vpack.c.bf16 %v2493_v39, %v2493_v39 }
 0x1ce   : > { %v1175_v24 = vpop.f32.mrf.mxu0 }
 0x1cf   : > { %v1181_v25 = vmul.f32 0.35355338, %v1175_v24 }
 0x1d0   : > { %v2023_v26 = vpop.f32.mrf.mxu0 }
 0x1d1   : > { %v1182_v27 = vadd.f32 %v1181_v25, %v2514_v17 }
 0x1d2   : > { %v1178_v28 = vpop.f32.mrf.mxu0 }
 0x1d3   : > { %v1183_v29 = vsel %vm1022_vm2, %v1182_v27, -inf }
 0x1d4   : > { %1184 = vmax.xlane.f32.xlu0 %v1183_v29  ;;  %v2024_v30 = vpop.f32.mrf.mxu0 }
 0x255   : > { %v1073_v31 = vpop.xlane.xlu0 %1072 }
 0x256   : > { %v1074_v32 = vsub.f32 %v1070_v20, %v1073_v31 }
 0x258   : > { %v1075_v33 = vmul.f32 1.442695, %v1074_v32 }
 0x25a   : > { %2146 = vpow2.f32 %v1075_v33 }
 0x25d   : > { %v1185_v34 = vpop.xlane.xlu0 %1184 }
 0x25e   : > { %v1186_v35 = vsub.f32 %v1182_v27, %v1185_v34 }
 0x260   : > { %v1187_v36 = vmul.f32 1.442695, %v1186_v35 }
 0x262   : > { %2148 = vpow2.f32 %v1187_v36 }
 0x267   : > { %v2147_v37 = vpop.eup %2146 }
 0x268   : > { %v1077_v38 = vsel %vm1022_vm2, %v2147_v37, 0.0 }
 0x269   : > { %1078 = vadd.xlane.f32.xlu1 %v1077_v38 }
 0x26f   : > { %v2149_v41 = vpop.eup %2148 }
 0x270   : > { %v1189_v42 = vsel %vm1022_vm2, %v2149_v41, 0.0 }
 0x271   : > { %1190 = vadd.xlane.f32.xlu1 %v1189_v42 }
 0x2f2   : > { %v1079_v55 = vpop.xlane.xlu1 %1078 }
 0x2f3   : > { %2150 = vrcp.f32 %v1079_v55 }
 0x2fa   : > { %v1191_v56 = vpop.xlane.xlu1 %1190 }
 0x2fb   : > { %2152 = vrcp.f32 %v1191_v56 }
 0x300   : > { %v2151_v59 = vpop.eup %2150 }
 0x301   : > { %v1081_v60 = vmul.f32 %v2151_v59, %v2147_v37  ;;  %v1562_v59 = vsel %vm1086_vm3, %v1497_v43, 0 }
 0x303   : > { %v1082_v62 = vpack.c.bf16 %v1081_v60, %v1081_v60 }
 0x305   : > { %2016 = vmatmul.mubr.msk.bf16.vlgmr.msra.gmra.mxu1 %vm1022_vm2, %v1082_v62 }
 0x306   : > { %2026 = vmatpush3.bf16.msra.mxu1 %v1199_v61  ;;  %2027 = vmatprep.mubr.msk.bf16.mxu1 %vm2240_vm0, %v2239_v1 }
 0x307   : > { %2037 = vmatprep.subr.bf16.mxu1 %v2239_v1 }
 0x308   : > { %v2153_v63 = vpop.eup %2152 }
 0x309   : > { %v1193_v2 = vmul.f32 %v2153_v63, %v2149_v41 }
 0x30b   : > { %v1194_v3 = vpack.c.bf16 %v1193_v2, %v1193_v2 }
 0x30d   : > { %2028 = vmatmul.mubr.msk.bf16.vlgmr.msra.gmra.mxu1 %vm1022_vm2, %v1194_v3 }
 0x30e   : > { %2038 = vmatpush3.bf16.msra.mxu1 %v1294_v4  ;;  %2039 = vmatprep.mubr.msk.bf16.mxu1 %vm2240_vm0, %v2239_v1 }
 0x30f   : > { %2049 = vmatprep.subr.bf16.mxu1 %v2239_v1 }
 0x3c5   : > { %v1124_v9 = vpop.f32.mrf.mxu1 }
 0x3c6   : > { %v1130_v10 = vpack.c.bf16 %v1124_v9, %v1124_v9 }
 0x3c7   : > { %v2017_v11 = vpop.f32.mrf.mxu1 }
 0x3c8   : > { %2040 = vmatmul.mubr.msk.bf16.vlgmr.msra.gmra.mxu1 %vm1022_vm2, %v1130_v10 }
 0x3c9   : > { %2050 = vmatpush3.bf16.msra.mxu1 %v1403_v12  ;;  %v1127_v13 = vpop.f32.mrf.mxu1  ;;  %2051 = vmatprep.mubr.msk.bf16.mxu1 %vm2240_vm0, %v2239_v1 }
 0x3ca   : > { %2061 = vmatprep.subr.bf16.mxu1 %v2239_v1 }
 0x3cb   : > { %v2018_v14 = vpop.f32.mrf.mxu1 }
 0x3cd   : > { %v1235_v16 = vpop.f32.mrf.mxu1 }
 0x3ce   : > { %v1241_v8 = vpack.c.bf16 %v1235_v16, %v1235_v16 }
 0x3cf   : > { %v2029_v18 = vpop.f32.mrf.mxu1 }
 0x3d0   : > { %2034 = vmatmul.mubr.msk.bf16.vlgmr.msra.gmra.mxu0 %vm1022_vm2, %v1241_v8 }
 0x3d1   : > { %2044 = vmatpush3.bf16.xpose.msra.mxu0 %v1343_v19  ;;  %v1238_v20 = vpop.f32.mrf.mxu1  ;;  %2045 = vmatprep.mubr.msk.bf16.mxu0 %vm2240_vm0, %v2239_v1 }
 0x3d2   : > { %2055 = vmatprep.subr.bf16.mxu0 %v2239_v1 }
 0x3d3   : > { %v2030_v21 = vpop.f32.mrf.mxu1 }
 0x3d8   : > { %2046 = vmatmul.mubr.msk.bf16.vlgmr.msra.gmra.mxu0 %vm1022_vm2, %v1336_v22 }
 0x3d9   : > { %2057 = vmatprep.mubr.msk.bf16.mxu0 %vm2240_vm0, %v2239_v1  ;;  %2056 = vmatpush3.bf16.msra.mxu0 %v1452_v46 }
 0x3da   : > { %2067 = vmatprep.subr.bf16.mxu0 %v2239_v1 }
 0x488   : > { %v1330_v58 = vpop.f32.mrf.mxu1 }
 0x48a   : > { %v2041_v23 = vpop.f32.mrf.mxu1 }
 0x48c   : > { %v1333_v24 = vpop.f32.mrf.mxu1 }
 0x48e   : > { %v2042_v25 = vpop.f32.mrf.mxu1 }
 0x490   : > { %v1284_v26 = vpop.f32.mrf.mxu0 }
 0x491   : > { %v2563_v27 = vadd.f32 %v1330_v58, %v1284_v26 }
 0x492   : > { %v2035_v28 = vpop.f32.mrf.mxu0 }
 0x494   : > { %v1287_v29 = vpop.f32.mrf.mxu0 }
 0x496   : > { %v2036_v30 = vpop.f32.mrf.mxu0 }
 0x498   : > { %v1379_v31 = vpop.f32.mrf.mxu0 }
 0x499   : > { %v1385_v32 = vmul.f32 0.35355338, %v1379_v31 }
 0x49a   : > { %v2047_v33 = vpop.f32.mrf.mxu0 }
 0x49b   : > { %v1386_v39 = vadd.f32 %v1385_v32, %v2514_v17 }
 0x49c   : > { %v1382_v34 = vpop.f32.mrf.mxu0 }
 0x49d   : > { %v1387_v35 = vsel %vm1022_vm2, %v1386_v39, -inf }
 0x49e   : > { %1388 = vmax.xlane.f32.xlu0 %v1387_v35  ;;  %v2048_v36 = vpop.f32.mrf.mxu0 }
 0x527   : > { %v1389_v37 = vpop.xlane.xlu0 %1388 }
 0x528   : > { %v1390_v38 = vsub.f32 %v1386_v39, %v1389_v37 }
 0x52a   : > { %v1391_v41 = vmul.f32 1.442695, %v1390_v38 }
 0x52c   : > { %2154 = vpow2.f32 %v1391_v41 }
 0x539   : > { %v2155_v42 = vpop.eup %2154 }
 0x53a   : > { %v1393_v44 = vsel %vm1022_vm2, %v2155_v42, 0.0 }
 0x53b   : > { %1394 = vadd.xlane.f32.xlu1 %v1393_v44 }
 0x5c4   : > { %v1395_v47 = vpop.xlane.xlu1 %1394 }
 0x5c5   : > { %2156 = vrcp.f32 %v1395_v47 }
 0x5d2   : > { %v2157_v48 = vpop.eup %2156 }
 0x5d3   : > { %v1397_v50 = vmul.f32 %v2157_v48, %v2155_v42 }
 0x5d5   : > { %v1398_v52 = vpack.c.bf16 %v1397_v50, %v1397_v50 }
 0x5d7   : > { %2052 = vmatmul.mubr.msk.bf16.vlgmr.msra.gmra.mxu1 %vm1022_vm2, %v1398_v52 }
 0x5d8   : > { %2062 = vmatpush3.bf16.xpose.msra.mxu1 %v1502_v53  ;;  %2063 = vmatprep.mubr.msk.bf16.mxu1 %vm2240_vm0, %v2239_v1 }
 0x5d9   : > { %2073 = vmatprep.subr.bf16.mxu1 %v2239_v1 }
 0x5df   : > { %2064 = vmatmul.mubr.msk.bf16.vlgmr.msra.gmra.mxu1 %vm1022_vm2, %v1495_v54 }
 0x5e0   : > { %2075 = vmatprep.mubr.msk.bf16.mxu1 %vm2240_vm0, %v2239_v1 }
 0x697   : > { %v1439_v55 = vpop.f32.mrf.mxu1 }
 0x698   : > { %v1445_v56 = vpack.c.bf16 %v1439_v55, %v1439_v55 }
 0x699   : > { %v2053_v57 = vpop.f32.mrf.mxu1 }
 0x69a   : > { %2058 = vmatmul.mubr.msk.bf16.vlgmr.msra.gmra.mxu0 %vm1022_vm2, %v1445_v56 }
 0x69b   : > { %2068 = vmatpush3.bf16.msra.mxu0 %v1562_v59  ;;  %v1442_v60 = vpop.f32.mrf.mxu1  ;;  %2069 = vmatprep.mubr.msk.bf16.mxu0 %vm2240_vm0, %v2239_v1 }
 0x69d   : > { %v2054_v40 = vpop.f32.mrf.mxu1 }
 0x69f   : > { %v1538_v61 = vpop.f32.mrf.mxu1 }
 0x6a0   : > { %v1544_v62 = vmul.f32 0.35355338, %v1538_v61 }
 0x6a1   : > { %v2065_v63 = vpop.f32.mrf.mxu1 }
 0x6a2   : > { %v1545_v0 = vadd.f32 %v1544_v62, %v2514_v17  ;;  %v1845_v17 = vld [vmem:[%s2655_s7 + $0xc] sm:$0xf] }
 0x6a3   : > { %v1541_v2 = vpop.f32.mrf.mxu1  ;;  %v1611_v13 = vsel %vm1086_vm3, %v1845_v17, 0 }
 0x6a4   : > { %v1546_v51 = vsel %vm1022_vm2, %v1545_v0, -inf  ;;  %2074 = vmatpush3.bf16.msra.mxu1 %v1611_v13 }
 0x6a5   : > { %1547 = vmax.xlane.f32.xlu0 %v1546_v51  ;;  %v2066_v3 = vpop.f32.mrf.mxu1 }
 0x72e   : > { %v1548_v4 = vpop.xlane.xlu0 %1547 }
 0x72f   : > { %v1549_v5 = vsub.f32 %v1545_v0, %v1548_v4 }
 0x731   : > { %v1550_v6 = vmul.f32 1.442695, %v1549_v5 }
 0x733   : > { %2158 = vpow2.f32 %v1550_v6 }
 0x740   : > { %v2159_v7 = vpop.eup %2158 }
 0x741   : > { %v1552_v9 = vsel %vm1022_vm2, %v2159_v7, 0.0 }
 0x742   : > { %1553 = vadd.xlane.f32.xlu1 %v1552_v9 }
 0x75a   : > { %v1488_v1 = vpop.f32.mrf.mxu0 }
 0x75b   : > { %v1494_v10 = vadd.f32 %v1488_v1, %v2563_v27 }
 0x75c   : > { %v2059_v11 = vpop.f32.mrf.mxu0 }
 0x75e   : > { %v1491_v12 = vpop.f32.mrf.mxu0 }
 0x760   : > { %v2060_v14 = vpop.f32.mrf.mxu0 }
 0x7cb   : > { %v1554_v15 = vpop.xlane.xlu1 %1553 }
 0x7cc   : > { %2160 = vrcp.f32 %v1554_v15 }
 0x7d9   : > { %v2161_v16 = vpop.eup %2160 }
 0x7da   : > { %v1556_v8 = vmul.f32 %v2161_v16, %v2159_v7 }
 0x7dc   : > { %v1557_v18 = vpack.c.bf16 %v1556_v8, %v1556_v8 }
 0x7de   : > { %2070 = vmatmul.mubr.msk.bf16.vlgmr.msra.gmra.mxu0 %vm1022_vm2, %v1557_v18 }
 0x89e   : > { %v1598_v19 = vpop.f32.mrf.mxu0 }
 0x89f   : > { %v1604_v20 = vpack.c.bf16 %v1598_v19, %v1598_v19 }
 0x8a0   : > { %v2071_v21 = vpop.f32.mrf.mxu0 }
 0x8a1   : > { %2076 = vmatmul.mubr.msk.bf16.vlgmr.msra.gmra.mxu1 %vm1022_vm2, %v1604_v20 }
 0x8a2   : > { %v1601_v22 = vpop.f32.mrf.mxu0 }
 0x8a4   : > { %v2072_v58 = vpop.f32.mrf.mxu0 }
 0x961   : > { %v1647_v23 = vpop.f32.mrf.mxu1 }
 0x962   : > { %v1653_v24 = vadd.f32 %v1647_v23, %v1494_v10 }
 0x963   : > { %v2077_v25 = vpop.f32.mrf.mxu1 }
 0x964   : > { %1654 = vst.msk [vmem:[%s302_s24] sm:$0xff] %vm338_vm1, %v1653_v24 }
 0x965   : > { %v1650_v26 = vpop.f32.mrf.mxu1 }
 0x966   : > { %2187 = shalt.err (!%p2184_p8)
}
 0x967   : > { %s2188_s16 = scalar_lea.hbm %s2606_s30, 128  ;;  %s2192_s22 = scalar_lea.hbm %s2656_s8, 256 }
 0x968   : > { %p2189_p9 = scmp.ne.s32.totalorder %s2606_s30, %s2188_s16  ;;  %p2193_p0 = scmp.lt.s32.totalorder %s2606_s30, %s2656_s8 }
 0x969   : > { %p2194_p1 = scmp.lt.s32.totalorder %s2192_s22, %s2188_s16 }
 0x96a   : > { %p2190_p12 = pnand %p2189_p9, %p2329_p10 }
 0x96b   : > { %p2195_p2 = por %p2194_p1, %p2193_p0 }
 0x96c   : > { %p2191_p13 = pneg %p2190_p12 }
 0x96e   : > { %p2196_p3 = pnand %p2195_p2, %p2191_p13 }
 0x970   : > { %2199 = shalt.err (!%p2196_p3)
}
 0x971   : > { %2079 = dma.vmem_to_hbm [thread:$0]  (%p2329_p10), %s2608_s25, 128, %s2606_s30, %s1656_s28   ;;  %v2078_v27 = vpop.f32.mrf.mxu1 }
 0x972 PF: > { %p2085_p4 = scmp.ge.s32.totalorder %s2236_s12, 2  ;;  %s1681_s26 = sand.u32 1, %s2224_s10  }
 0x973   : > { %s1682_s27 = scalar_lea.sflag [#allocation5], %s1681_s26 }
 0x974   : > { %p2082_p5 = pnand %p2085_p4, %p2333_p11 }
 0x976   : > { %p2083_p6 = pneg %p2082_p5 }
 0x978   : > { %2219 = dma.done.wait (%p2083_p6), %s1682_s27, 128  }
 0x979   : > { %2221 = vsyncadd (%p2083_p6), %s1682_s27, 4294967168  ;;  %p24_p7 = scmp.ge.s32.totalorder %s2316_s15, 4   ;;  %s2659_s10 = smov %s2228_s11 }
 0x97a   : > { %s2660_s11 = smov %s2232_s0  ;;  %s2661_s0 = smov %s2327_s18 }
 0x97b   : > { %s2662_s12 = smov %s2316_s15  ;;  %26 = sbr.rel (!%p24_p7) target bundleno = 18 (0x12), region = 101 }
 0x980   :  { %1687 = vsyncpa [#allocation5], 1 }
 0x981   :  { %1689 = vsyncpa [#allocation5 + $0x1], 1 }

</bundles_post_ra>
